<compile_context>
chip_gen: v5e
topology: v5e:2x2
jax: 0.10.0
libtpu: 0.0.40
codegen_flags: <defaults>
</compile_context>

<pallas_src>
import functools

import jax
import jax.numpy as jnp
from jax import lax
from jax.experimental import pallas as pl
from jax.experimental.pallas import tpu as pltpu


def _round_up(x: int, m: int) -> int:
    return ((x + m - 1) // m) * m


def linear_kernel(x_ref, w_ref, b_ref, o_ref, acc_ref):
    # x_ref: (TM, TK), w_ref: (C_pad, TK), b_ref: (1, C_pad),
    # o_ref: (TM, C_pad), acc_ref: (TM, C_pad) f32 scratch.
    k = pl.program_id(1)

    @pl.when(k == 0)
    def _():
        acc_ref[...] = jnp.zeros_like(acc_ref)

    acc_ref[...] += lax.dot_general(
        x_ref[...], w_ref[...],
        dimension_numbers=(((1,), (1,)), ((), ())),   # contract the F axis
        preferred_element_type=jnp.float32,
    )

    @pl.when(k == pl.num_programs(1) - 1)
    def _():
        o_ref[...] = (acc_ref[...] + b_ref[...]).astype(o_ref.dtype)


@functools.partial(jax.jit, static_argnames=("use_bf16", "tm", "tk"))
def classifier_lr_forward(x, weight, bias, *, use_bf16=False, tm=512, tk=512):
    """x: (B, F), weight: (C, F), bias: (C,)  ->  (B, C) float32."""
    B, F = x.shape
    C = weight.shape[0]

    # --- lane-dense class dim -------------------------------------------------
    C_pad = _round_up(max(C, 128), 128)
    w_p = jnp.pad(weight, ((0, C_pad - C), (0, 0)))          # (C_pad, F)
    b_p = jnp.pad(bias, (0, C_pad - C)).reshape(1, C_pad)    # (1, C_pad)

    # --- feature (contraction) tiling ------------------------------------------
    TK = min(tk, _round_up(F, 128))          # multiple of 128
    F_pad = _round_up(F, TK)
    if F_pad != F:
        x = jnp.pad(x, ((0, 0), (0, F_pad - F)))
        w_p = jnp.pad(w_p, ((0, 0), (0, F_pad - F)))

    # --- batch tiling ----------------------------------------------------------
    TM = min(tm, _round_up(B, 8))
    B_pad = _round_up(B, TM)
    x_p = x if B_pad == B else jnp.pad(x, ((0, B_pad - B), (0, 0)))

    # --- optional bf16 operands (f32 accumulation in-kernel) --------------------
    if use_bf16:
        x_p = x_p.astype(jnp.bfloat16)
        w_p = w_p.astype(jnp.bfloat16)

    out = pl.pallas_call(
        linear_kernel,
        out_shape=jax.ShapeDtypeStruct((B_pad, C_pad), jnp.float32),
        grid_spec=pltpu.PrefetchScalarGridSpec(
            num_scalar_prefetch=0,
            grid=(B_pad // TM, F_pad // TK),
            in_specs=[
                pl.BlockSpec((TM, TK), lambda i, k: (i, k)),      # x tile
                pl.BlockSpec((C_pad, TK), lambda i, k: (0, k)),   # W tile
                pl.BlockSpec((1, C_pad), lambda i, k: (0, 0)),    # resident bias
            ],
            out_specs=pl.BlockSpec((TM, C_pad), lambda i, k: (i, 0)),
            scratch_shapes=[pltpu.VMEM((TM, C_pad), jnp.float32)],
        ),
        compiler_params=pltpu.CompilerParams(
            dimension_semantics=("parallel", "arbitrary"),
        ),
    )(x_p, w_p, b_p)

    return out[:B, :C]


if __name__ == "__main__":
    # Small shapes consistent with the module: n_features=32, n_class=2, batch=8
    B, F, C = 8, 32, 2

    key = jax.random.PRNGKey(0)
    kx, kw, kb = jax.random.split(key, 3)

    x = jax.random.normal(kx, (B, F), dtype=jnp.float32)
    # Deterministic "nn.Linear"-style init (uniform in +/- 1/sqrt(F))
    bound = 1.0 / (F ** 0.5)
    weight = jax.random.uniform(kw, (C, F), minval=-bound, maxval=bound,
                                dtype=jnp.float32)
    bias = jax.random.uniform(kb, (C,), minval=-bound, maxval=bound,
                              dtype=jnp.float32)

    y_ref = x @ weight.T + bias

    # Exact f32 path.
    y = classifier_lr_forward(x, weight, bias, use_bf16=False)
    y = jax.block_until_ready(y)
    assert y.shape == (B, C)
    assert jnp.allclose(y, y_ref, atol=1e-5, rtol=1e-5)

    # bf16-operand path (f32 accumulation) — looser tolerance.
    y_bf16 = classifier_lr_forward(x, weight, bias, use_bf16=True)
    y_bf16 = jax.block_until_ready(y_bf16)
    assert y_bf16.shape == (B, C)
    assert jnp.allclose(y_bf16, y_ref, atol=2e-2, rtol=2e-2)

    print("KERNEL_OK")
</pallas_src>

<mosaic_0001>
module attributes {stable_mosaic.version = 11 : i64} {
  func.func @linear_kernel(%arg0: i32, %arg1: i32, %arg2: memref<8x128xf32, #tpu.memory_space<vmem>>, %arg3: memref<128x128xf32, #tpu.memory_space<vmem>>, %arg4: memref<1x128xf32, #tpu.memory_space<vmem>>, %arg5: memref<8x128xf32, #tpu.memory_space<vmem>>, %arg6: memref<8x128xf32, #tpu.memory_space<vmem>>) attributes {dimension_semantics = [#tpu.dimension_semantics<parallel>, #tpu.dimension_semantics<arbitrary>], iteration_bounds = array<i64: 1, 1>, scalar_prefetch = 0 : i64, scratch_operands = 1 : i64, tpu.core_type = #tpu.core_type<tc>, window_params = [{transform_indices = @transform_0, window_bounds = array<i64: 8, 128>}, {transform_indices = @transform_1, window_bounds = array<i64: 128, 128>}, {pipeline_mode = #tpu.pipeline_mode<synchronous>, transform_indices = @transform_2, window_bounds = array<i64: 1, 128>}, {transform_indices = @transform_3, window_bounds = array<i64: 8, 128>}]} {
    %c0_i32 = arith.constant 0 : i32
    %0 = arith.cmpi eq, %arg1, %c0_i32 : i32
    %1 = arith.extui %0 : i1 to i32
    %c0_i32_0 = arith.constant 0 : i32
    %2 = arith.cmpi ne, %1, %c0_i32_0 : i32
    scf.if %2 {
      %cst_10 = arith.constant 0.000000e+00 : f32
      %12 = vector.broadcast %cst_10 : f32 to vector<8x128xf32>
      %c0_11 = arith.constant 0 : index
      %c0_12 = arith.constant 0 : index
      %13 = vector.load %arg6[%c0_11, %c0_12] : memref<8x128xf32, #tpu.memory_space<vmem>>, vector<8x128xf32>
      tpu.vector_store %arg6[%c0_11, %c0_12], %12 {strides = array<i32>} : memref<8x128xf32, #tpu.memory_space<vmem>>, vector<8x128xf32>,
    } else {
    }
    %c0 = arith.constant 0 : index
    %c0_1 = arith.constant 0 : index
    %3 = vector.load %arg6[%c0, %c0_1] : memref<8x128xf32, #tpu.memory_space<vmem>>, vector<8x128xf32>
    %c0_2 = arith.constant 0 : index
    %c0_3 = arith.constant 0 : index
    %4 = vector.load %arg2[%c0_2, %c0_3] : memref<8x128xf32, #tpu.memory_space<vmem>>, vector<8x128xf32>
    %c0_4 = arith.constant 0 : index
    %c0_5 = arith.constant 0 : index
    %5 = vector.load %arg3[%c0_4, %c0_5] : memref<128x128xf32, #tpu.memory_space<vmem>>, vector<128x128xf32>
    %cst = arith.constant dense<0.000000e+00> : vector<8x128xf32>
    %6 = tpu.matmul %4, %5, %cst {dimension_numbers = #tpu.dot_dimension_numbers<[1], [1], [0], [0], [0, 0, 1, 0], [], []>} : vector<8x128xf32>, vector<128x128xf32>, vector<8x128xf32> -> vector<8x128xf32>
    %7 = arith.addf %3, %6 : vector<8x128xf32>
    %c0_6 = arith.constant 0 : index
    %c0_7 = arith.constant 0 : index
    %8 = vector.load %arg6[%c0_6, %c0_7] : memref<8x128xf32, #tpu.memory_space<vmem>>, vector<8x128xf32>
    tpu.vector_store %arg6[%c0_6, %c0_7], %7 {strides = array<i32>} : memref<8x128xf32, #tpu.memory_space<vmem>>, vector<8x128xf32>,
    %c0_i32_8 = arith.constant 0 : i32
    %9 = arith.cmpi eq, %arg1, %c0_i32_8 : i32
    %10 = arith.extui %9 : i1 to i32
    %c0_i32_9 = arith.constant 0 : i32
    %11 = arith.cmpi ne, %10, %c0_i32_9 : i32
    scf.if %11 {
      %c0_10 = arith.constant 0 : index
      %c0_11 = arith.constant 0 : index
      %12 = vector.load %arg6[%c0_10, %c0_11] : memref<8x128xf32, #tpu.memory_space<vmem>>, vector<8x128xf32>
      %c0_12 = arith.constant 0 : index
      %c0_13 = arith.constant 0 : index
      %13 = vector.load %arg4[%c0_12, %c0_13] : memref<1x128xf32, #tpu.memory_space<vmem>>, vector<1x128xf32>
      %14 = vector.broadcast %13 : vector<1x128xf32> to vector<8x128xf32>
      %15 = arith.addf %12, %14 : vector<8x128xf32>
      %c0_14 = arith.constant 0 : index
      %c0_15 = arith.constant 0 : index
      %16 = vector.load %arg5[%c0_14, %c0_15] : memref<8x128xf32, #tpu.memory_space<vmem>>, vector<8x128xf32>
      tpu.vector_store %arg5[%c0_14, %c0_15], %15 {strides = array<i32>} : memref<8x128xf32, #tpu.memory_space<vmem>>, vector<8x128xf32>,
    } else {
    }
    return
  }
  func.func @transform_0(%arg0: i32, %arg1: i32) -> (i32, i32) {
    %c0_i32 = arith.constant 0 : i32
    return %arg0, %arg1 : i32, i32
  }
  func.func @transform_1(%arg0: i32, %arg1: i32) -> (i32, i32) {
    %c0_i32 = arith.constant 0 : i32
    %c0_i32_0 = arith.constant 0 : i32
    return %c0_i32, %arg1 : i32, i32
  }
  func.func @transform_2(%arg0: i32, %arg1: i32) -> (i32, i32) {
    %c0_i32 = arith.constant 0 : i32
    %c0_i32_0 = arith.constant 0 : i32
    %c0_i32_1 = arith.constant 0 : i32
    return %c0_i32, %c0_i32_0 : i32, i32
  }
  func.func @transform_3(%arg0: i32, %arg1: i32) -> (i32, i32) {
    %c0_i32 = arith.constant 0 : i32
    %c0_i32_0 = arith.constant 0 : i32
    return %arg0, %c0_i32 : i32, i32
  }
}

</mosaic_0001>

<bundles_post_ra>
// kernel: classifier_lr_forward.1
= control target key start
LH: loop header
LB: loop body
LE: loop exit
PB: predicated region body
PF: predicated region fallthrough
CT: control target
= control target key end

     0   :  { %s151_s1 = inlined_call_operand.vmem [shape: f32[128,128], index: 1, kind: input, shape index: {}]   ;;  %s152_s2 = inlined_call_operand.vmem [shape: f32[1,128], index: 2, kind: input, shape index: {}]   ;;  %s153_s0 = inlined_call_operand.vmem [shape: f32[8,128], index: 0, kind: input, shape index: {}]   ;;  %s154_s3 = inlined_call_operand.vmem [shape: f32[8,128], index: 3, kind: output, shape index: {}]  }
   0x1   :  { %v36_v0 = vld [vmem:[%s151_s1 + $0x78] sm:$0xff]  ;;  %v35_v1 = vld [vmem:[%s151_s1 + $0x70] sm:$0xff]  ;;  %v34_v2 = vld [vmem:[%s151_s1 + $0x68] sm:$0xff] }
   0x2   :  { %37 = vmatpush.xpose.msra.mxu0 %v36_v0  ;;  %v33_v3 = vld [vmem:[%s151_s1 + $0x60] sm:$0xff]  ;;  %v32_v4 = vld [vmem:[%s151_s1 + $0x58] sm:$0xff]  ;;  %v31_v5 = vld [vmem:[%s151_s1 + $0x50] sm:$0xff] }
   0x3   :  { %v30_v6 = vld [vmem:[%s151_s1 + $0x48] sm:$0xff]  ;;  %v29_v7 = vld [vmem:[%s151_s1 + $0x40] sm:$0xff]  ;;  %v28_v8 = vld [vmem:[%s151_s1 + $0x38] sm:$0xff] }
   0x4   :  { %v27_v9 = vld [vmem:[%s151_s1 + $0x30] sm:$0xff]  ;;  %v26_v10 = vld [vmem:[%s151_s1 + $0x28] sm:$0xff]  ;;  %v25_v11 = vld [vmem:[%s151_s1 + $0x20] sm:$0xff] }
   0x5   :  { %v24_v12 = vld [vmem:[%s151_s1 + $0x18] sm:$0xff]  ;;  %v23_v13 = vld [vmem:[%s151_s1 + $0x10] sm:$0xff]  ;;  %v22_v14 = vld [vmem:[%s151_s1 + $0x8] sm:$0xff] }
   0x6   :  { %38 = vmatpush.xpose.msra.mxu0 %v35_v1  ;;  %v21_v15 = vld [vmem:[%s151_s1] sm:$0xff] }
   0x7   :  { %v20_v16 = vld [vmem:[%s153_s0] sm:$0xff] }
   0x8   :  { %v73_v17 = vld [vmem:[%s152_s2] ss:$0 sm:$0xff] }
   0xa   :  { %39 = vmatpush.xpose.msra.mxu0 %v34_v2 }
   0xe   :  { %40 = vmatpush.xpose.msra.mxu0 %v33_v3 }
  0x12   :  { %41 = vmatpush.xpose.msra.mxu0 %v32_v4 }
  0x16   :  { %42 = vmatpush.xpose.msra.mxu0 %v31_v5 }
  0x1a   :  { %43 = vmatpush.xpose.msra.mxu0 %v30_v6 }
  0x1e   :  { %44 = vmatpush.xpose.msra.mxu0 %v29_v7 }
  0x22   :  { %45 = vmatpush.xpose.msra.mxu0 %v28_v8 }
  0x26   :  { %46 = vmatpush.xpose.msra.mxu0 %v27_v9 }
  0x2a   :  { %47 = vmatpush.xpose.msra.mxu0 %v26_v10 }
  0x2e   :  { %48 = vmatpush.xpose.msra.mxu0 %v25_v11 }
  0x32   :  { %49 = vmatpush.xpose.msra.mxu0 %v24_v12 }
  0x36   :  { %50 = vmatpush.xpose.msra.mxu0 %v23_v13 }
  0x3a   :  { %51 = vmatpush.xpose.msra.mxu0 %v22_v14 }
  0x3e   :  { %52 = vmatpush.xpose.msra.mxu0 %v21_v15 }
  0x41   :  { %53 = vmatmul.f32.vlgmr.msra.gmra.mxu0 %v20_v16 }
  0xbe   :  { %v54_v18 = vpop.f32.mrf.mxu0 }
  0xbf   :  { %v67_v19 = vadd.f32 %v73_v17, %v54_v18 }
  0xc1   :  { %68 = vst [vmem:[%s154_s3] sm:$0xff] %v67_v19 }

</bundles_post_ra>
